<compile_context>
chip_gen: v7x
topology: tpu7x:2x2x1
jax: 0.10.0
libtpu: 0.0.40
codegen_flags: <defaults>
</compile_context>

<pallas_src>
import functools

import jax
import jax.numpy as jnp
from jax import lax
from jax.experimental import pallas as pl
from jax.experimental.pallas import tpu as pltpu


def _round_up(x, m):
    return ((x + m - 1) // m) * m


def _cdiv(a, b):
    return (a + b - 1) // b


# Max lanes per pixel tile.  Sized for v7x (64 MiB VMEM/TC): double-buffered
# pred+tgt input blocks (~2-4 MiB) plus ~8 materialized (8, TILE_N) f32/i32
# temporaries (~8 MiB) fit comfortably under the 32 MiB scoped request, while
# the ~0.35 us/step grid overhead stays negligible on all generations.
_TILE_N_MAX = 32 * 1024


def _stats_kernel(pred_ref, tgt_ref, out_ref, *, num_classes, c_pad, tile_n,
                  n_pixels, tiles_per_split):
    """Accumulate per-class reductions over one (C, TILE_N) pixel tile.

    out_ref (c_pad, 128) is the resident accumulator for one (batch, split)
    output block.  Columns: 0=sum(pred*true_1hot), 1=sum(pred),
    2=sum(true_1hot), 3=tp, 4=#(argmax(pred)==c & valid target).
    """
    split = pl.program_id(1)
    n_tile = pl.program_id(2)

    @pl.when(n_tile == 0)
    def _init():
        out_ref[...] = jnp.zeros_like(out_ref)

    C = num_classes

    # Ragged-tail / split-overhang lane mask: global pixel index vs. true N.
    # (The index_map clamps overhanging tiles onto the last real block; this
    # mask zeroes their contribution, so no wrapper-side jnp.pad is needed.)
    g_tile = split * tiles_per_split + n_tile
    pixel0 = g_tile * tile_n
    lane_pos = pixel0 + lax.broadcasted_iota(jnp.int32, (1, tile_n), 1)
    in_bounds = lane_pos < n_pixels                               # (1, TN)

    # Predictions: native dtype in HBM, f32 on the VPU; out-of-range lanes -> 0
    # (also squashes any NaN garbage in the padded tail of a partial block).
    p = jnp.where(in_bounds, pred_ref[...].astype(jnp.float32), 0.0)   # (C, TN)
    tgt = jnp.where(in_bounds, tgt_ref[...], -1)                        # (1, TN)

    cls_iota = lax.broadcasted_iota(jnp.int32, (C, tile_n), 0)
    tc = (tgt == cls_iota).astype(jnp.float32)                    # target 1-hot
    valid = jnp.logical_and(tgt >= 0, tgt < C).astype(jnp.float32)      # (1, TN)

    # Per-pixel argmax over classes, first-max wins (matches torch.argmax).
    # TODO(synk): on v6e/v7x the soft/hard confusion matrices could instead be
    # dot_general(p, tc^T)/(pc, tc^T) on the otherwise idle MXU, and the target
    # sublane broadcast could ride a stride-0 vld; both need on-HW validation
    # (bundle dump) before switching, so the proven VPU/XLU path is kept.
    p_max = jnp.max(p, axis=0, keepdims=True)                            # (1, TN)
    pred_cls = jnp.min(jnp.where(p == p_max, cls_iota, C),
                       axis=0, keepdims=True)                            # (1, TN)
    pc = (pred_cls == cls_iota).astype(jnp.float32)               # pred 1-hot

    # Five per-class lane reductions; fp / fn / tn / n_valid are derived in
    # the wrapper (identity trick: fp = sum_pc_valid - tp, fn = sum_t - tp).
    inter = jnp.sum(p * tc, axis=1, keepdims=True)                # (C, 1)
    sum_p = jnp.sum(p, axis=1, keepdims=True)                     # (C, 1)
    sum_t = jnp.sum(tc, axis=1, keepdims=True)                    # (C, 1)
    tp = jnp.sum(pc * tc, axis=1, keepdims=True)                  # (C, 1)
    sum_pc = jnp.sum(pc * valid, axis=1, keepdims=True)           # (C, 1)

    # One full-width accumulate straight into the resident output block
    # (no scratch accumulator, no finalize copy, no per-column masked RMWs).
    stats = jnp.concatenate(
        [inter, sum_p, sum_t, tp, sum_pc,
         jnp.zeros((C, 128 - 5), jnp.float32)], axis=1)           # (C, 128)
    if c_pad > C:
        stats = jnp.concatenate(
            [stats, jnp.zeros((c_pad - C, 128), jnp.float32)], axis=0)
    out_ref[...] += stats


def compute_perclass_stats(pred_bcn, tgt_b1n, *, num_classes):
    """Per-class reductions as an (8-padded-C, 128) f32 slab (see kernel doc)."""
    B, C, N = pred_bcn.shape
    assert C == num_classes
    c_pad = _round_up(max(C, 8), 8)

    # Balanced pixel tiles: padding waste < 128 lanes per tile.  Small N uses
    # a single full-extent block (lane dim == full array dim -> no padding).
    if N <= _TILE_N_MAX:
        tile_n, num_tiles = N, 1
    else:
        num_tiles = _cdiv(N, _TILE_N_MAX)
        tile_n = _round_up(_cdiv(N, num_tiles), 128)
        num_tiles = _cdiv(N, tile_n)

    # Optional pixel-axis split so both v7x TensorCores get work when B == 1.
    n_par = 2 if (B == 1 and num_tiles >= 2) else 1
    tiles_per_split = _cdiv(num_tiles, n_par)
    last_tile = num_tiles - 1

    def in_map(b, s, n):
        # Clamp the (at most one) overhanging tile of the last split onto the
        # final real block; the kernel's lane mask zeroes its contribution.
        return (b, 0, jnp.minimum(s * tiles_per_split + n, last_tile))

    kern = functools.partial(
        _stats_kernel, num_classes=C, c_pad=c_pad, tile_n=tile_n,
        n_pixels=N, tiles_per_split=tiles_per_split)

    out = pl.pallas_call(
        kern,
        out_shape=jax.ShapeDtypeStruct((B, n_par, c_pad, 128), jnp.float32),
        grid=(B, n_par, tiles_per_split),
        in_specs=[
            pl.BlockSpec((None, C, tile_n), in_map),
            pl.BlockSpec((None, 1, tile_n), in_map),
        ],
        out_specs=pl.BlockSpec((None, None, c_pad, 128),
                               lambda b, s, n: (b, s, 0, 0)),
        compiler_params=pltpu.CompilerParams(
            dimension_semantics=("parallel", "parallel", "arbitrary"),
            vmem_limit_bytes=32 * 1024 * 1024,
        ),
    )(pred_bcn, tgt_b1n)
    # Tiny (B, n_par, 8, 128) partials -> reduce in plain JAX; keeps both
    # leading grid axes truly 'parallel' (megacore-shardable).
    return jnp.sum(out, axis=(0, 1))                              # (c_pad, 128)


class MetricsPallas:
    """JAX/Pallas re-implementation of Models/metric.py::Metrics.forward."""

    def __init__(self, mode, threshold, ignore_index, num_classes, smooth):
        # TODO(synk): only the multiclass path is implemented; mode/threshold
        # (binary / multilabel smp paths) are accepted but unused, as in the
        # reference forward().
        self.mode = mode
        self.threshold = threshold
        self.ignore_index = ignore_index
        self.num_classes = num_classes
        self.smooth = smooth
        self.class_weights = jnp.array(
            [9.450701046744278, 56.85972429356364, 26.286454373302785,
             1474.9347269860261, 39.9524139620338, 1.2302386418184008],
            dtype=jnp.float32)

    def __call__(self, outputs, targets):
        B, C, H, W = outputs.shape
        assert C == self.num_classes
        N = H * W

        # Contiguous (B, C, N) view of the predictions in their native dtype
        # (no HBM transpose, no wrapper-side f32 up-cast pass).
        pred = outputs.reshape(B, C, N)

        # Targets: accept either a one-hot (B, C, H, W) tensor (module's use
        # case -- argmax'd once, the same op the torch reference applies
        # before get_stats) or an integer (B, H, W) class map passed straight
        # through, which skips a full HBM read of the one-hot volume.
        if targets.ndim == 4:
            # TODO(synk): all-zero one-hot rows (ignore pixels) argmax to
            # class 0, exactly as torch.argmax does in the reference.
            tgt_idx = jnp.argmax(targets, axis=1).astype(jnp.int32)
        else:
            tgt_idx = targets.astype(jnp.int32)
        tgt_idx = jnp.where(tgt_idx == self.ignore_index,
                            jnp.int32(-1), tgt_idx)
        tgt_idx = tgt_idx.reshape(B, 1, N)

        acc = compute_perclass_stats(pred, tgt_idx, num_classes=C)

        inter = acc[0:C, 0]          # sum(pred * true_onehot) per class
        sum_p = acc[0:C, 1]          # sum(pred)               per class
        sum_t = acc[0:C, 2]          # sum(true_onehot)        per class
        tp = acc[0:C, 3]
        sum_pc_valid = acc[0:C, 4]   # #(argmax(pred)==c & valid)
        n_valid = jnp.sum(sum_t)     # each valid pixel hits exactly one class

        fp = sum_pc_valid - tp
        fn = sum_t - tp
        tn = n_valid - tp - fp - fn

        s = self.smooth
        mean_dice = jnp.mean((2.0 * inter + s) / (sum_t + sum_p + s))
        mean_iou = jnp.mean((inter + s) / (sum_t + sum_p - inter + s))

        # smp-style "weighted" reduction: per-class score on stats summed over
        # images, combined with normalized class weights.
        w = self.class_weights / jnp.sum(self.class_weights)

        def safe_div(num, den):
            # zero_division -> 0.0 (matches smp's "warn" handling numerically)
            return jnp.where(den > 0, num / jnp.where(den > 0, den, 1.0), 0.0)

        def fbeta(beta):
            b2 = beta * beta
            return jnp.sum(w * safe_div((1.0 + b2) * tp,
                                        (1.0 + b2) * tp + b2 * fn + fp))

        iou_score = jnp.sum(w * safe_div(tp, tp + fp + fn))
        f1_score = fbeta(1.0)
        balanced_acc = jnp.sum(
            w * 0.5 * (safe_div(tp, tp + fn) + safe_div(tn, tn + fp)))
        precision = jnp.sum(w * safe_div(tp, tp + fp))
        recall = jnp.sum(w * safe_div(tp, tp + fn))

        # TODO(synk): torch's .item() host syncs are omitted; JAX scalars returned.
        return {
            "iou_score_globally": iou_score,
            "f1_score_globally": f1_score,
            "balanced_accuracy_globally": balanced_acc,
            "precision_globally": precision,
            "recall_globally": recall,
            "f_precision_globally": fbeta(0.5),
            "f_recall_globally": fbeta(2.0),
            "mean_iou": mean_iou,
            "mean_dice": mean_dice,
        }


if __name__ == "__main__":
    B, C, H, W = 2, 6, 16, 16
    key = jax.random.PRNGKey(0)
    k_out, k_tgt = jax.random.split(key)

    # outputs: per-pixel class probabilities; targets: one-hot GT (NCHW).
    logits = jax.random.normal(k_out, (B, C, H, W), dtype=jnp.float32)
    outputs = jax.nn.softmax(logits, axis=1)
    tgt_cls = jax.random.randint(k_tgt, (B, H, W), 0, C)
    targets = jnp.transpose(
        jax.nn.one_hot(tgt_cls, C, dtype=jnp.float32), (0, 3, 1, 2))

    metrics_mod = MetricsPallas(mode="multiclass", threshold=0.5,
                                ignore_index=255, num_classes=C, smooth=1.0)
    result = jax.block_until_ready(metrics_mod(outputs, targets))

    for _k, _v in result.items():
        assert jnp.isfinite(_v), f"non-finite metric {_k}"

    # Cheap pure-JAX cross-check of the MeanDice / MeanIoU path.
    pred_f = outputs.reshape(B, C, -1).astype(jnp.float32)
    tgt_f = targets.reshape(B, C, -1).astype(jnp.float32)
    inter_r = jnp.sum(pred_f * tgt_f, axis=(0, 2))
    sp_r = jnp.sum(pred_f, axis=(0, 2))
    st_r = jnp.sum(tgt_f, axis=(0, 2))
    dice_ref = jnp.mean((2.0 * inter_r + 1.0) / (st_r + sp_r + 1.0))
    iou_ref = jnp.mean((inter_r + 1.0) / (st_r + sp_r - inter_r + 1.0))
    assert jnp.allclose(result["mean_dice"], dice_ref, rtol=1e-4, atol=1e-5)
    assert jnp.allclose(result["mean_iou"], iou_ref, rtol=1e-4, atol=1e-5)

    print("KERNEL_OK")
</pallas_src>

<mosaic_0001>
module attributes {stable_mosaic.version = 11 : i64} {
  func.func @_stats_kernel(%arg0: i32, %arg1: i32, %arg2: i32, %arg3: memref<1x6x256xf32, #tpu.memory_space<vmem>>, %arg4: memref<1x1x256xi32, #tpu.memory_space<vmem>>, %arg5: memref<1x1x8x128xf32, #tpu.memory_space<vmem>>) attributes {dimension_semantics = [#tpu.dimension_semantics<parallel>, #tpu.dimension_semantics<parallel>, #tpu.dimension_semantics<arbitrary>], iteration_bounds = array<i64: 2, 1, 1>, scalar_prefetch = 0 : i64, scratch_operands = 0 : i64, tpu.core_type = #tpu.core_type<tc>, window_params = [{transform_indices = @transform_0, window_bounds = array<i64: 1, 6, 256>}, {transform_indices = @transform_1, window_bounds = array<i64: 1, 1, 256>}, {transform_indices = @transform_2, window_bounds = array<i64: 1, 1, 8, 128>}]} {
    %c0_i32 = arith.constant 0 : i32
    %0 = arith.cmpi eq, %arg2, %c0_i32 : i32
    %1 = arith.extui %0 : i1 to i32
    %c0_i32_0 = arith.constant 0 : i32
    %2 = arith.cmpi ne, %1, %c0_i32_0 : i32
    scf.if %2 {
      %cst_26 = arith.constant 0.000000e+00 : f32
      %69 = vector.broadcast %cst_26 : f32 to vector<8x128xf32>
      %c0_27 = arith.constant 0 : index
      %c0_28 = arith.constant 0 : index
      %c0_29 = arith.constant 0 : index
      %c0_30 = arith.constant 0 : index
      %70 = vector.load %arg5[%c0_27, %c0_28, %c0_29, %c0_30] : memref<1x1x8x128xf32, #tpu.memory_space<vmem>>, vector<1x1x8x128xf32>
      %71 = vector.shape_cast %70 : vector<1x1x8x128xf32> to vector<8x128xf32>
      %72 = vector.shape_cast %69 : vector<8x128xf32> to vector<1x1x8x128xf32>
      tpu.vector_store %arg5[%c0_27, %c0_28, %c0_29, %c0_30], %72 {strides = array<i32>} : memref<1x1x8x128xf32, #tpu.memory_space<vmem>>, vector<1x1x8x128xf32>,
    } else {
    }
    %c1_i32 = arith.constant 1 : i32
    %3 = arith.muli %arg1, %c1_i32 : i32
    %4 = arith.addi %3, %arg2 : i32
    %c256_i32 = arith.constant 256 : i32
    %5 = arith.muli %4, %c256_i32 : i32
    %6 = tpu.iota {dimensions = array<i32: 1>} : vector<1x256xi32>
    %7 = vector.broadcast %5 : i32 to vector<1x256xi32>
    %8 = arith.addi %7, %6 : vector<1x256xi32>
    %c256_i32_1 = arith.constant 256 : i32
    %9 = vector.broadcast %c256_i32_1 : i32 to vector<1x256xi32>
    %10 = arith.cmpi slt, %8, %9 : vector<1x256xi32>
    %c0 = arith.constant 0 : index
    %c0_2 = arith.constant 0 : index
    %c0_3 = arith.constant 0 : index
    %11 = vector.load %arg3[%c0, %c0_2, %c0_3] : memref<1x6x256xf32, #tpu.memory_space<vmem>>, vector<1x6x256xf32>
    %12 = vector.shape_cast %11 : vector<1x6x256xf32> to vector<6x256xf32>
    %cst = arith.constant 0.000000e+00 : f32
    %13 = vector.shape_cast %10 : vector<1x256xi1> to vector<1x256xi1>
    %14 = vector.broadcast %13 : vector<1x256xi1> to vector<6x256xi1>
    %15 = vector.broadcast %cst : f32 to vector<6x256xf32>
    %16 = arith.select %14, %12, %15 : vector<6x256xi1>, vector<6x256xf32>
    %c0_4 = arith.constant 0 : index
    %c0_5 = arith.constant 0 : index
    %c0_6 = arith.constant 0 : index
    %17 = vector.load %arg4[%c0_4, %c0_5, %c0_6] : memref<1x1x256xi32, #tpu.memory_space<vmem>>, vector<1x1x256xi32>
    %18 = vector.shape_cast %17 : vector<1x1x256xi32> to vector<1x256xi32>
    %c-1_i32 = arith.constant -1 : i32
    %19 = vector.broadcast %c-1_i32 : i32 to vector<1x256xi32>
    %20 = arith.select %10, %18, %19 : vector<1x256xi1>, vector<1x256xi32>
    %21 = tpu.iota {dimensions = array<i32: 0>} : vector<6x256xi32>
    %22 = vector.broadcast %20 : vector<1x256xi32> to vector<6x256xi32>
    %23 = arith.cmpi eq, %22, %21 : vector<6x256xi32>
    %24 = arith.extui %23 : vector<6x256xi1> to vector<6x256xi32>
    %25 = arith.sitofp %24 : vector<6x256xi32> to vector<6x256xf32>
    %c0_i32_7 = arith.constant 0 : i32
    %26 = vector.broadcast %c0_i32_7 : i32 to vector<1x256xi32>
    %27 = arith.cmpi sge, %20, %26 : vector<1x256xi32>
    %c6_i32 = arith.constant 6 : i32
    %28 = vector.broadcast %c6_i32 : i32 to vector<1x256xi32>
    %29 = arith.cmpi slt, %20, %28 : vector<1x256xi32>
    %30 = arith.andi %27, %29 : vector<1x256xi1>
    %31 = arith.extui %30 : vector<1x256xi1> to vector<1x256xi32>
    %32 = arith.sitofp %31 : vector<1x256xi32> to vector<1x256xf32>
    %cst_8 = arith.constant dense<0xFF800000> : vector<256xf32>
    %33 = vector.multi_reduction <maximumf>, %16, %cst_8 [0] : vector<6x256xf32> to vector<256xf32>
    %34 = vector.shape_cast %33 : vector<256xf32> to vector<1x256xf32>
    %35 = vector.broadcast %34 : vector<1x256xf32> to vector<6x256xf32>
    %36 = arith.cmpf oeq, %16, %35 : vector<6x256xf32>
    %c6_i32_9 = arith.constant 6 : i32
    %37 = vector.broadcast %c6_i32_9 : i32 to vector<6x256xi32>
    %38 = arith.select %36, %21, %37 : vector<6x256xi1>, vector<6x256xi32>
    %cst_10 = arith.constant dense<2147483647> : vector<256xi32>
    %39 = vector.multi_reduction <minsi>, %38, %cst_10 [0] : vector<6x256xi32> to vector<256xi32>
    %40 = vector.shape_cast %39 : vector<256xi32> to vector<1x256xi32>
    %41 = vector.broadcast %40 : vector<1x256xi32> to vector<6x256xi32>
    %42 = arith.cmpi eq, %41, %21 : vector<6x256xi32>
    %43 = arith.extui %42 : vector<6x256xi1> to vector<6x256xi32>
    %44 = arith.sitofp %43 : vector<6x256xi32> to vector<6x256xf32>
    %45 = arith.mulf %16, %25 : vector<6x256xf32>
    %cst_11 = arith.constant dense<0.000000e+00> : vector<6xf32>
    %46 = vector.multi_reduction <add>, %45, %cst_11 [1] : vector<6x256xf32> to vector<6xf32>
    %47 = vector.shape_cast %46 : vector<6xf32> to vector<6x1xf32>
    %cst_12 = arith.constant dense<0.000000e+00> : vector<6xf32>
    %48 = vector.multi_reduction <add>, %16, %cst_12 [1] : vector<6x256xf32> to vector<6xf32>
    %49 = vector.shape_cast %48 : vector<6xf32> to vector<6x1xf32>
    %cst_13 = arith.constant dense<0.000000e+00> : vector<6xf32>
    %50 = vector.multi_reduction <add>, %25, %cst_13 [1] : vector<6x256xf32> to vector<6xf32>
    %51 = vector.shape_cast %50 : vector<6xf32> to vector<6x1xf32>
    %52 = arith.mulf %44, %25 : vector<6x256xf32>
    %cst_14 = arith.constant dense<0.000000e+00> : vector<6xf32>
    %53 = vector.multi_reduction <add>, %52, %cst_14 [1] : vector<6x256xf32> to vector<6xf32>
    %54 = vector.shape_cast %53 : vector<6xf32> to vector<6x1xf32>
    %55 = vector.broadcast %32 : vector<1x256xf32> to vector<6x256xf32>
    %56 = arith.mulf %44, %55 : vector<6x256xf32>
    %cst_15 = arith.constant dense<0.000000e+00> : vector<6xf32>
    %57 = vector.multi_reduction <add>, %56, %cst_15 [1] : vector<6x256xf32> to vector<6xf32>
    %58 = vector.shape_cast %57 : vector<6xf32> to vector<6x1xf32>
    %cst_16 = arith.constant 0.000000e+00 : f32
    %59 = vector.broadcast %cst_16 : f32 to vector<6x123xf32>
    %60 = tpu.concatenate %47, %49, %51, %54, %58, %59 in 1 : vector<6x1xf32>, vector<6x1xf32>, vector<6x1xf32>, vector<6x1xf32>, vector<6x1xf32>, vector<6x123xf32> -> vector<6x128xf32>
    %cst_17 = arith.constant 0.000000e+00 : f32
    %61 = vector.broadcast %cst_17 : f32 to vector<2x128xf32>
    %62 = tpu.concatenate %60, %61 in 0 : vector<6x128xf32>, vector<2x128xf32> -> vector<8x128xf32>
    %c0_18 = arith.constant 0 : index
    %c0_19 = arith.constant 0 : index
    %c0_20 = arith.constant 0 : index
    %c0_21 = arith.constant 0 : index
    %63 = vector.load %arg5[%c0_18, %c0_19, %c0_20, %c0_21] : memref<1x1x8x128xf32, #tpu.memory_space<vmem>>, vector<1x1x8x128xf32>
    %64 = vector.shape_cast %63 : vector<1x1x8x128xf32> to vector<8x128xf32>
    %65 = arith.addf %64, %62 : vector<8x128xf32>
    %c0_22 = arith.constant 0 : index
    %c0_23 = arith.constant 0 : index
    %c0_24 = arith.constant 0 : index
    %c0_25 = arith.constant 0 : index
    %66 = vector.load %arg5[%c0_22, %c0_23, %c0_24, %c0_25] : memref<1x1x8x128xf32, #tpu.memory_space<vmem>>, vector<1x1x8x128xf32>
    %67 = vector.shape_cast %66 : vector<1x1x8x128xf32> to vector<8x128xf32>
    %68 = vector.shape_cast %65 : vector<8x128xf32> to vector<1x1x8x128xf32>
    tpu.vector_store %arg5[%c0_22, %c0_23, %c0_24, %c0_25], %68 {strides = array<i32>} : memref<1x1x8x128xf32, #tpu.memory_space<vmem>>, vector<1x1x8x128xf32>,
    return
  }
  func.func @transform_0(%arg0: i32, %arg1: i32, %arg2: i32) -> (i32, i32, i32) {
    %c1_i32 = arith.constant 1 : i32
    %0 = arith.muli %arg1, %c1_i32 : i32
    %1 = arith.addi %0, %arg2 : i32
    %c0_i32 = arith.constant 0 : i32
    %2 = arith.minsi %1, %c0_i32 : i32
    %c0_i32_0 = arith.constant 0 : i32
    %c0_i32_1 = arith.constant 0 : i32
    return %arg0, %c0_i32_0, %2 : i32, i32, i32
  }
  func.func @transform_1(%arg0: i32, %arg1: i32, %arg2: i32) -> (i32, i32, i32) {
    %c1_i32 = arith.constant 1 : i32
    %0 = arith.muli %arg1, %c1_i32 : i32
    %1 = arith.addi %0, %arg2 : i32
    %c0_i32 = arith.constant 0 : i32
    %2 = arith.minsi %1, %c0_i32 : i32
    %c0_i32_0 = arith.constant 0 : i32
    %c0_i32_1 = arith.constant 0 : i32
    return %arg0, %c0_i32_0, %2 : i32, i32, i32
  }
  func.func @transform_2(%arg0: i32, %arg1: i32, %arg2: i32) -> (i32, i32, i32, i32) {
    %c0_i32 = arith.constant 0 : i32
    %c0_i32_0 = arith.constant 0 : i32
    %c0_i32_1 = arith.constant 0 : i32
    return %arg0, %arg1, %c0_i32, %c0_i32_0 : i32, i32, i32, i32
  }
}

</mosaic_0001>

<bundles_post_ra>
// kernel: tpu_custom_call.1
= control target key start
LH: loop header
LB: loop body
LE: loop exit
PB: predicated region body
PF: predicated region fallthrough
CT: control target
= control target key end

     0   :  { %7 = vsyncpa [#allocation3], 0  ;;  %s839_s0 = inlined_call_operand.vmem [shape: f32[2,6,256], index: 0, kind: input, shape index: {}]   ;;  %s840_s1 = inlined_call_operand.vmem [shape: s32[2,1,256], index: 1, kind: input, shape index: {}]   ;;  %s841_s2 = inlined_call_operand.hbm [shape: f32[2,1,8,128], index: 2, kind: output, shape index: {}]  }
   0x1   :  { %9 = vsyncpa [#allocation3 + $0x1], 0  ;;  %s692_s9 = smov 0   ;;  %s694_s10 = smov 0  }
   0x2   :  { %s696_s11 = smov 0   ;;  %s698_s12 = smov 0  }
   0x3   :  { %s700_s13 = smov 0   ;;  %s702_s14 = smov 0  }
   0x4 LB: > { %s519_s15 = sadd.s32 4294967295, %s673_s14   ;;  %s520_s16 = sadd.s32 4294967294, %s673_s14   ;;  %s673_s14 = sphi %s702_s14, %s15_s14   ;;  %s669_s13 = sphi %s700_s13, %s848_s13   ;;  %s665_s12 = sphi %s698_s12, %s847_s12   ;;  %s661_s11 = sphi %s696_s11, %s846_s11   ;;  %s657_s10 = sphi %s694_s10, %s845_s10   ;;  %s653_s9 = sphi %s692_s9, %s844_s9  }
   0x5   : > { %s34_s17 = sadd.s32 1, %s669_s13  ;;  %s111_s18 = sadd.s32 1, %s661_s11 }
   0x6   : > { %p36_p0 = scmp.ge.s32.totalorder %s34_s17, 2  ;;  %p121_p1 = scmp.ne.s32.totalorder %s661_s11, %s657_s10 }
   0x7   : > { %p122_p2 = scmp.eq.s32.totalorder %s519_s15, 1  ;;  %p127_p3 = scmp.ne.s32.totalorder %s657_s10, %s653_s9 }
   0x8   : > { %s850_s17 = smov (%p36_p0, %s34_s17), 0  ;;  %p128_p5 = scmp.eq.s32.totalorder %s520_s16, 1 }
   0x9   : > { %p732_p4 = por %p122_p2, %p121_p1  ;;  %s106_s20 = ssub.s32 %s669_s13, %s850_s17 }
   0xa   : > { %p523_p6 = scmp.ge.s32.totalorder %s673_s14, 1  ;;  %p109_p7 = scmp.eq.s32.totalorder %s106_s20, 0 }
   0xb   : > { %p739_p8 = por %p128_p5, %p127_p3  ;;  %p183_p9 = scmp.lt.s32.totalorder %s673_s14, 3 }
   0xc   : > { %s745_s22 = scalar_select %p109_p7, %s661_s11, %s111_s18  }
   0xd   : > { %p184_p10 = pnand %p523_p6, %p183_p9 }
   0xe   : > { %p227_p11 = scmp.lt.s32.totalorder (!%p184_p10), %s665_s12, 1  ;;  %v278_v0 = vlaneseq (!%p184_p10)  ;;  %vm314_vm0 = vcmask (!%p184_p10), 1045504   ;;  %v675_v21 = vmov (!%p184_p10), 0.0   ;;  %s220_s4 = sand.u32 (!%p184_p10), 1, %s657_s10  }
   0xf   : > { %187 = sbr.rel (%p184_p10) target bundleno = 223 (0xdf), region = 28  ;;  %s524_s5 = sshll.u32 (!%p184_p10), %s220_s4, 3 }
  0x10   : > { %v749_v1 = vshrl.u32 (!%p184_p10), %v278_v0, 7  ;;  %s535_s6 = sshll.u32 (!%p184_p10), %s665_s12, 7  ;;  %s222_s7 = scalar_lea.vmem (!%p184_p10), [#allocation2], %s524_s5 }
  0x11   : > { %s427_s8 = sshll.u32 (!%p184_p10), %s222_s7, 4  ;;  %s792_s18 = scalar_lea.hbm (!%p184_p10), %s841_s2, %s535_s6  ;;  %s794_s8 = int_to_ptr.vmem [resolvable:$true] %s427_s8 }
  0x12   : > { %v752_v2 = vsub.s32 (!%p184_p10), 0, %v749_v1  ;;  %v284_v3 = vsub.s32 (!%p184_p10), 1, %v749_v1  ;;  %s413_s20 = scalar_lea.sflag (!%p184_p10), [#allocation3], %s220_s4 }
  0x16   : > { %s228_s23 = scalar_select %p227_p11, %s665_s12, 1 }
  0x17   : > { %s676_s12 = smov [#allocation2]  }
  0x18   : > { %s538_s24 = sshll.u32 %s228_s23, 4  ;;  %s527_s25 = sshll.u32 %s228_s23, 1 }
  0x19   : > { %s234_s28 = scalar_lea.vmem %s839_s0, %s538_s24  ;;  %s249_s3 = scalar_lea.vmem %s840_s1, %s527_s25 }
  0x1a   : > { %v269_v4 = vld [vmem:[%s234_s28] sm:$0x3f]  ;;  %v270_v5 = vld [vmem:[%s234_s28 + $0x8] sm:$0x3f]  ;;  %s595_s23 = scalar_lea.vmem %s794_s8, 128  ;;  %s599_s24 = sshll.u32 %s676_s12, 4  ;;  %s600_s24 = int_to_ptr.vmem [resolvable:$false] %s599_s24 }
  0x1b   : > { %v277_v6 = vld [vmem:[%s249_s3] sm:$0x3]  ;;  %v322_v9 = vsel %vm314_vm0, %v270_v5, -inf  ;;  %v366_v10 = vsel %vm314_vm0, %v269_v4, 0.0  ;;  %v367_v12 = vsel %vm314_vm0, %v270_v5, 0.0  ;;  %v315_v13 = vsel %vm314_vm0, %v269_v4, -inf  ;;  %p596_p12 = scmp.ne.s32.totalorder %s794_s8, %s595_s23  ;;  %p602_p1 = scmp.lt.s32.totalorder %s794_s8, %s600_s24 }
  0x1c   : > { %v281_v7 = vrot.slane %v277_v6, %v752_v2  ;;  %v285_v8 = vrot.slane %v277_v6, %v284_v3  ;;  %v323_v11 = vrot.slane %v322_v9, 4  ;;  %v368_v14 = vadd.f32 %v367_v12, %v366_v10  ;;  %s601_s25 = scalar_lea.vmem %s600_s24, 256 }
  0x1d   : > { %v316_v15 = vrot.slane %v315_v13, 4  ;;  %p597_p13 = pnand %p596_p12, %p732_p4  ;;  %p603_p2 = scmp.lt.s32.totalorder %s601_s25, %s595_s23 }
  0x1e   : > { %v293_v16 = vrot.slane %v281_v7, %v752_v2  ;;  %v297_v17 = vrot.slane %v285_v8, %v752_v2  ;;  %v324_v18 = vmax.f32 %v322_v9, %v323_v11  ;;  %369 = vadd.xlane.f32.xlu0 %v368_v14  ;;  %vm305_vm5 = vcmp.ge.s32.totalorder %v285_v8, 0 }
  0x1f   : > { %v317_v19 = vmax.f32 %v315_v13, %v316_v15  ;;  %vm307_vm6 = vcmp.lt.s32.totalorder %v285_v8, 6  ;;  %vm304_vm8 = vcmp.ge.s32.totalorder %v281_v7, 0  ;;  %vm306_vm9 = vcmp.lt.s32.totalorder %v281_v7, 6  ;;  %p598_p0 = pneg %p597_p13  ;;  %p604_p3 = por %p603_p2, %p602_p1 }
  0x20   : > { %vm298_vm1 = vcmp.eq.s32.totalorder %v293_v16, %v749_v1  ;;  %vm299_vm2 = vcmp.eq.s32.totalorder %v297_v17, %v749_v1  ;;  %v325_v20 = vrot.slane %v324_v18, 2  ;;  %vm309_vm11 = vmand %vm305_vm5, %vm307_vm6  ;;  %vm400_vm5 = vcmask 15360  }
  0x21   : > { %v528_v22 = vsel %vm298_vm1, 1.0, %v675_v21  ;;  %v529_v23 = vsel %vm299_vm2, 1.0, %v675_v21  ;;  %v318_v24 = vrot.slane %v317_v19, 2  ;;  %vm308_vm12 = vmand %vm304_vm8, %vm306_vm9  ;;  %v531_v50 = vsel %vm309_vm11, 1.0, %v675_v21  ;;  %p605_p5 = pnand %p604_p3, %p598_p0 }
  0x22   : > { %v359_v25 = vmul.f32 %v528_v22, %v269_v4  ;;  %v360_v26 = vmul.f32 %v529_v23, %v270_v5  ;;  %v371_v27 = vsel %vm314_vm0, %v528_v22, 0.0  ;;  %v326_v28 = vmax.f32 %v324_v18, %v325_v20 }
  0x23   : > { %v372_v29 = vsel %vm314_vm0, %v529_v23, 0.0  ;;  %v319_v30 = vmax.f32 %v317_v19, %v318_v24  ;;  %v530_v53 = vsel %vm308_vm12, 1.0, %v675_v21  ;;  %v390_v55 = vrot.slane %v531_v50, %v752_v2 }
  0x24   : > { %v361_v31 = vsel %vm314_vm0, %v359_v25, 0.0  ;;  %v362_v32 = vsel %vm314_vm0, %v360_v26, 0.0  ;;  %v373_v33 = vadd.f32 %v372_v29, %v371_v27  ;;  %v327_v34 = vrot.slane %v326_v28, 1 }
  0x25   : > { %v363_v35 = vadd.f32 %v362_v32, %v361_v31  ;;  %v320_v36 = vrot.slane %v319_v30, 1  ;;  %v386_v57 = vrot.slane %v530_v53, %v752_v2  ;;  %vm402_vm6 = vcmask 23552  }
  0x26   : > { %374 = vadd.xlane.f32.xlu1 %v373_v33  ;;  %v328_v37 = vmax.f32 %v326_v28, %v327_v34  ;;  %vm406_vm8 = vcmask 39936  }
  0x27   : > { %364 = vadd.xlane.f32.xlu0 %v363_v35  ;;  %v321_v38 = vmax.f32 %v319_v30, %v320_v36 }
  0x28   : > { %vm330_vm3 = vcmp.eq.f32.partialorder %v270_v5, %v328_v37 }
  0x29   : > { %v332_v39 = vsel %vm330_vm3, %v749_v1, 6  ;;  %vm329_vm4 = vcmp.eq.f32.partialorder %v269_v4, %v321_v38 }
  0x2a   : > { %v343_v40 = vsel %vm314_vm0, %v332_v39, 2147483647  ;;  %v331_v41 = vsel %vm329_vm4, %v749_v1, 6  ;;  %vm398_vm4 = vcmask 7168  }
  0x2b   : > { %v344_v42 = vrot.slane %v343_v40, 4  ;;  %v333_v43 = vsel %vm314_vm0, %v331_v41, 2147483647 }
  0x2c   : > { %v334_v44 = vrot.slane %v333_v43, 4 }
  0x2d   : > { %vm345_vm7 = vcmp.lt.s32.totalorder %v343_v40, %v344_v42 }
  0x2e   : > { %vm335_vm10 = vcmp.lt.s32.totalorder %v333_v43, %v334_v44  ;;  %v346_v45 = vsel %vm345_vm7, %v343_v40, %v344_v42  ;;  %vm404_vm7 = vcmask 31744  }
  0x2f   : > { %v336_v46 = vsel %vm335_vm10, %v333_v43, %v334_v44  ;;  %v347_v47 = vrot.slane %v346_v45, 2 }
  0x30   : > { %v337_v48 = vrot.slane %v336_v46, 2 }
  0x31   : > { %vm348_vm13 = vcmp.lt.s32.totalorder %v346_v45, %v347_v47 }
  0x32   : > { %vm338_vm14 = vcmp.lt.s32.totalorder %v336_v46, %v337_v48  ;;  %v349_v49 = vsel %vm348_vm13, %v346_v45, %v347_v47 }
  0x33   : > { %v339_v51 = vsel %vm338_vm14, %v336_v46, %v337_v48  ;;  %v350_v52 = vrot.slane %v349_v49, 1 }
  0x34   : > { %v340_v54 = vrot.slane %v339_v51, 1 }
  0x35   : > { %vm351_vm15 = vcmp.lt.s32.totalorder %v349_v49, %v350_v52 }
  0x36   : > { %vm341_vm1 = vcmp.lt.s32.totalorder %v339_v51, %v340_v54  ;;  %v352_v56 = vsel %vm351_vm15, %v349_v49, %v350_v52 }
  0x37   : > { %v342_v58 = vsel %vm341_vm1, %v339_v51, %v340_v54  ;;  %vm354_vm2 = vcmp.eq.s32.totalorder %v352_v56, %v749_v1 }
  0x38   : > { %vm353_vm3 = vcmp.eq.s32.totalorder %v342_v58, %v749_v1  ;;  %v533_v59 = vsel %vm354_vm2, 1.0, %v675_v21 }
  0x39   : > { %v532_v60 = vsel %vm353_vm3, 1.0, %v675_v21  ;;  %v377_v61 = vmul.f32 %v533_v59, %v529_v23  ;;  %v392_v62 = vmul.f32 %v533_v59, %v390_v55 }
  0x3a   : > { %v376_v63 = vmul.f32 %v532_v60, %v528_v22  ;;  %v391_v0 = vmul.f32 %v532_v60, %v386_v57 }
  0x3b   : > { %v379_v3 = vsel %vm314_vm0, %v377_v61, 0.0  ;;  %v394_v4 = vsel %vm314_vm0, %v392_v62, 0.0 }
  0x3c   : > { %v378_v5 = vsel %vm314_vm0, %v376_v63, 0.0  ;;  %v393_v2 = vsel %vm314_vm0, %v391_v0, 0.0 }
  0x3d   : > { %v380_v6 = vadd.f32 %v379_v3, %v378_v5  ;;  %v395_v7 = vadd.f32 %v394_v4, %v393_v2 }
  0x3f   : > { %381 = vadd.xlane.f32.xlu1 %v380_v6  ;;  %396 = vadd.xlane.f32.xlu0 %v395_v7 }
  0xab   : > { %v370_v1 = vpop.xlane.xlu0 %369 }
  0xb3   : > { %v375_v9 = vpop.xlane.xlu1 %374 }
  0xb4   : > { %v365_v8 = vpop.xlane.xlu0 %364 }
  0xb5   : > { %v399_v10 = vsel %vm398_vm4, %v365_v8, %v370_v1 }
  0xb6   : > { %v401_v11 = vsel %vm400_vm5, %v399_v10, %v375_v9 }
  0xcc   : > { %v382_v12 = vpop.xlane.xlu1 %381  ;;  %v397_v13 = vpop.xlane.xlu0 %396 }
  0xcd   : > { %v403_v14 = vsel %vm402_vm6, %v401_v11, %v382_v12 }
  0xce   : > { %v405_v15 = vsel %vm404_vm7, %v403_v14, %v397_v13 }
  0xcf   : > { %v407_v16 = vsel %vm406_vm8, %v405_v15, 0.0 }
  0xd0   : > { %v408_v17 = vsel %vm314_vm0, %v407_v16, 0.0 }
  0xd1   : > { %411 = vst [vmem:[%s222_s7] sm:$0xff] %v408_v17 }
  0xd2   : > { %608 = shalt.err (!%p605_p5)
}
  0xd3   : > { %s609_s26 = scalar_lea.hbm %s792_s18, 128  ;;  %s613_s29 = scalar_lea.hbm %s841_s2, 256 }
  0xd4   : > { %p610_p6 = scmp.ne.s32.totalorder %s792_s18, %s609_s26  ;;  %p614_p10 = scmp.lt.u32.totalorder %s792_s18, %s841_s2 }
  0xd5   : > { %p615_p11 = scmp.lt.u32.totalorder %s613_s29, %s609_s26  ;;  %p617_p13 = scmp.lt.u32.totalorder %s609_s26, %s792_s18 }
  0xd6   : > { %p611_p7 = pnand %p610_p6, %p732_p4 }
  0xd7   : > { %p616_p12 = por %p615_p11, %p614_p10 }
  0xd8   : > { %p612_p9 = pneg %p611_p7 }
  0xd9   : > { %p618_p0 = por %p617_p13, %p616_p12 }
  0xdb   : > { %p619_p1 = pnand %p618_p0, %p612_p9 }
  0xdd   : > { %622 = shalt.err (!%p619_p1)
}
  0xde   : > { %539 = dma.vmem_to_hbm [thread:$0]  (%p732_p4), %s794_s8, 128, %s792_s18, %s413_s20  }
  0xdf PF: > { %p545_p2 = scmp.ge.s32.totalorder %s673_s14, 2  ;;  %s439_s4 = sand.u32 1, %s653_s9  }
  0xe0   : > { %s440_s5 = scalar_lea.sflag [#allocation3], %s439_s4 }
  0xe1   : > { %p542_p3 = pnand %p545_p2, %p739_p8 }
  0xe3   : > { %648 = dma.done.wait (!%p542_p3), %s440_s5, 128  }
  0xe4   : > { %650 = vsyncadd (!%p542_p3), %s440_s5, 4294967168  ;;  %s15_s14 = sadd.s32 1, %s673_s14   ;;  %s844_s9 = smov %s657_s10 }
  0xe5   : > { %p12_p5 = scmp.ge.s32.totalorder %s15_s14, 4   ;;  %s845_s10 = smov %s661_s11 }
  0xe6   : > { %s846_s11 = smov %s745_s22  ;;  %s847_s12 = smov %s669_s13 }
  0xe7   : > { %s848_s13 = smov %s850_s17  ;;  %14 = sbr.rel (!%p12_p5) target bundleno = 4 (0x4), region = 70 }
  0xee   :  { %445 = vsyncpa [#allocation3], 1 }
  0xef   :  { %447 = vsyncpa [#allocation3 + $0x1], 1 }

</bundles_post_ra>
